<compile_context>
chip_gen: v7x
topology: tpu7x:2x2x1
jax: 0.10.0
libtpu: 0.0.40
codegen_flags: <defaults>
</compile_context>

<pallas_src>
import functools

import jax
import jax.numpy as jnp
from jax.experimental import pallas as pl
from jax.experimental.pallas import tpu as pltpu

EPS = 1e-5


def _bn_train(z, gamma, beta):
    # BatchNorm1d in training mode: biased batch variance, eps=1e-5.
    mu = jnp.mean(z, axis=0, keepdims=True)
    var = jnp.mean((z - mu) ** 2, axis=0, keepdims=True)
    return (z - mu) * jax.lax.rsqrt(var + EPS) * gamma + beta


def _one_hot(idx_col, n):
    """[T,1] int32 indices -> [T,n] exact 0/1 one-hot mask in bf16 (VPU compare)."""
    iota = jax.lax.broadcasted_iota(jnp.int32, (idx_col.shape[0], n), 1)
    return jnp.where(iota == idx_col, 1.0, 0.0).astype(jnp.bfloat16)


def node_block_kernel(
    x_ref, ea_ref, row_ref, col_ref,
    w11a_ref, w11b_ref, b11_ref, g1_ref, be1_ref, w12_ref, b12_ref,
    w21a_ref, w21b_ref, b21_ref, g2_ref, be2_ref, w22_ref, b22_ref,
    out_ref,
    sumz_ref, ssq_ref, seg_ref, cnt_ref,
    *, inv_num_edges,
):
    p = pl.program_id(0)                 # 0: BN-stats pass over edges, 1: apply + scatter
    e = pl.program_id(1)                 # edge-block index
    last_e = pl.num_programs(1) - 1
    te = ea_ref.shape[0]
    n = x_ref.shape[0]

    @pl.when((p == 0) & (e == 0))
    def _init():
        sumz_ref[...] = jnp.zeros_like(sumz_ref)
        ssq_ref[...] = jnp.zeros_like(ssq_ref)
        seg_ref[...] = jnp.zeros_like(seg_ref)
        cnt_ref[...] = jnp.zeros_like(cnt_ref)

    # ---- node_mlp_1 Lin1 on cat([x[row], edge_attr]) for this edge block, as a
    # split matmul. The x[row] gather is an exact one-hot row-pick on the MXU
    # (0/1 mask times bf16 x: selected values are reproduced bit-exactly).
    oh_row = _one_hot(row_ref[...], n)                                   # [TE, N] bf16
    xg = jnp.dot(oh_row, x_ref[...], preferred_element_type=jnp.float32)  # == x[row_blk]
    z1 = (jnp.dot(xg.astype(jnp.bfloat16), w11a_ref[...],
                  preferred_element_type=jnp.float32)
          + jnp.dot(ea_ref[...], w11b_ref[...],
                    preferred_element_type=jnp.float32)
          + b11_ref[...])                                                # [TE, H] f32

    @pl.when(p == 0)
    def _accumulate_bn_stats():
        sumz_ref[...] += jnp.sum(z1, axis=0, keepdims=True)
        ssq_ref[...] += jnp.sum(z1 * z1, axis=0, keepdims=True)

    @pl.when(p == 1)
    def _apply_and_scatter():
        # BatchNorm1d over all E edges (biased variance), ReLU, Lin2.
        mu = sumz_ref[...] * inv_num_edges
        var = jnp.maximum(ssq_ref[...] * inv_num_edges - mu * mu, 0.0)
        zn = (z1 - mu) * jax.lax.rsqrt(var + EPS) * g1_ref[...] + be1_ref[...]
        zn = jnp.maximum(zn, 0.0)
        m1 = (jnp.dot(zn.astype(jnp.bfloat16), w12_ref[...],
                      preferred_element_type=jnp.float32) + b12_ref[...])  # [TE, H]

        # Scatter-add this edge block into the resident [N, H] accumulator (MXU):
        #   seg[n] += sum_t [col[t]==n] * m1[t];   cnt[n] += #(col==n).
        oh_colT = _one_hot(col_ref[...], n)                               # [TE, N]
        seg_ref[...] += jax.lax.dot_general(
            oh_colT, m1.astype(jnp.bfloat16),
            dimension_numbers=(((0,), (0,)), ((), ())),
            preferred_element_type=jnp.float32)
        cnt_ref[...] += jax.lax.dot_general(
            oh_colT, jnp.ones((te, 1), jnp.bfloat16),
            dimension_numbers=(((0,), (0,)), ((), ())),
            preferred_element_type=jnp.float32)

    @pl.when((p == 1) & (e == last_e))
    def _finalize():
        # scatter_mean: multiply by reciprocal of counts. Nodes with no incoming
        # edge get agg=0 (matches scatter_mean's 0-fill). approx=True would move
        # this to the EUP at ~1e-3 relative error; kept exact here.
        inv_cnt = pl.reciprocal(jnp.maximum(cnt_ref[...], 1.0), approx=False)
        agg = seg_ref[...] * inv_cnt                                      # [N, H] f32

        # node_mlp_2 on cat([x, agg]) as a split matmul.
        z2 = (jnp.dot(x_ref[...], w21a_ref[...], preferred_element_type=jnp.float32)
              + jnp.dot(agg.astype(jnp.bfloat16), w21b_ref[...],
                        preferred_element_type=jnp.float32)
              + b21_ref[...])
        mu2 = jnp.mean(z2, axis=0, keepdims=True)
        var2 = jnp.mean((z2 - mu2) ** 2, axis=0, keepdims=True)
        zn2 = (z2 - mu2) * jax.lax.rsqrt(var2 + EPS) * g2_ref[...] + be2_ref[...]
        zn2 = jnp.maximum(zn2, 0.0)
        out_ref[...] = (jnp.dot(zn2.astype(jnp.bfloat16), w22_ref[...],
                                preferred_element_type=jnp.float32)
                        + b22_ref[...]).astype(out_ref.dtype)


def node_block_forward(x, edge_index, edge_attr, params, *, edge_block=8):
    N, _ = x.shape
    E, hidden = edge_attr.shape
    if edge_block % 8 != 0 and edge_block != E:
        raise ValueError("edge_block must be a multiple of 8 (sublane tiling)")
    if E % edge_block != 0:
        # TODO(synk): mask padded edge rows (BN stats, scatter counts) to support ragged E.
        raise ValueError("E must be a multiple of edge_block")
    ke = E // edge_block

    bf = lambda a: a.astype(jnp.bfloat16)      # MXU operands in bf16, f32 accumulation
    row = edge_index[0].astype(jnp.int32).reshape(E, 1)
    col = edge_index[1].astype(jnp.int32).reshape(E, 1)

    operands = (
        bf(x), bf(edge_attr), row, col,
        bf(params["w11a"]), bf(params["w11b"]), params["b11"], params["g1"], params["be1"],
        bf(params["w12"]), params["b12"],
        bf(params["w21a"]), bf(params["w21b"]), params["b21"], params["g2"], params["be2"],
        bf(params["w22"]), params["b22"],
    )

    # Whole-array VMEM-resident blocks (constant index map -> fetched once).
    def full(a):
        return pl.BlockSpec(a.shape, lambda p, e: (0, 0))

    # Edge-tiled blocks (re-fetched per E-block; double-buffered by Pallas).
    def edge_blk(a):
        return pl.BlockSpec((edge_block, a.shape[1]), lambda p, e: (e, 0))

    in_specs = [full(x), edge_blk(edge_attr), edge_blk(row), edge_blk(col)]
    in_specs += [full(o) for o in operands[4:]]

    kernel = functools.partial(node_block_kernel, inv_num_edges=1.0 / E)

    return pl.pallas_call(
        kernel,
        out_shape=jax.ShapeDtypeStruct((N, hidden), jnp.float32),
        grid_spec=pltpu.PrefetchScalarGridSpec(
            num_scalar_prefetch=0,
            grid=(2, ke),                   # (pass, edge-block): pass 0 = BN stats, 1 = apply+scatter
            in_specs=in_specs,
            out_specs=pl.BlockSpec((N, hidden), lambda p, e: (0, 0)),
            scratch_shapes=[
                pltpu.VMEM((1, hidden), jnp.float32),   # sum(z1) for BN1
                pltpu.VMEM((1, hidden), jnp.float32),   # sum(z1^2) for BN1
                pltpu.VMEM((N, hidden), jnp.float32),   # scatter-sum accumulator
                pltpu.VMEM((N, 1), jnp.float32),        # per-node in-degree counts
            ],
        ),
        compiler_params=pltpu.CompilerParams(
            # Both axes are sequential: pass-0 stats must precede pass-1, and the
            # edge axis accumulates into shared VMEM scratch.
            dimension_semantics=("arbitrary", "arbitrary"),
            vmem_limit_bytes=32 * 1024 * 1024,
        ),
    )(*operands)


def init_params(key, n_in, hidden):
    f_in = n_in + hidden
    ks = jax.random.split(key, 4)

    def lin(k, fin, fout):
        k1, k2 = jax.random.split(k)
        bound = 1.0 / jnp.sqrt(fin)
        w = jax.random.uniform(k1, (fin, fout), jnp.float32, -bound, bound)
        b = jax.random.uniform(k2, (1, fout), jnp.float32, -bound, bound)
        return w, b

    w11, b11 = lin(ks[0], f_in, hidden)
    w12, b12 = lin(ks[1], hidden, hidden)
    w21, b21 = lin(ks[2], f_in, hidden)
    w22, b22 = lin(ks[3], hidden, hidden)
    ones = jnp.ones((1, hidden), jnp.float32)
    zeros = jnp.zeros((1, hidden), jnp.float32)
    return {
        # W11 / W21 split row-wise so cat([a, b]) @ W == a @ Wa + b @ Wb (no lane concat).
        "w11a": w11[:n_in], "w11b": w11[n_in:], "b11": b11, "g1": ones, "be1": zeros,
        "w12": w12, "b12": b12,
        "w21a": w21[:n_in], "w21b": w21[n_in:], "b21": b21, "g2": ones, "be2": zeros,
        "w22": w22, "b22": b22,
    }


def reference_forward(x, edge_index, edge_attr, p, *, mxu_dtype=jnp.float32):
    """Pure-JAX reference mirroring the PyTorch module (training-mode BN).

    mxu_dtype=jnp.bfloat16 reproduces the kernel's MXU input precision
    (f32 accumulation, f32 BN stats); jnp.float32 is the exact-f32 module.
    """
    N = x.shape[0]
    row, col = edge_index[0], edge_index[1]
    dot = lambda a, b: jnp.dot(a.astype(mxu_dtype), b.astype(mxu_dtype),
                               preferred_element_type=jnp.float32)
    z = dot(x[row], p["w11a"]) + dot(edge_attr, p["w11b"]) + p["b11"]
    z = _bn_train(z, p["g1"], p["be1"])
    z = jnp.maximum(z, 0.0)
    m1 = dot(z, p["w12"]) + p["b12"]
    m1 = m1.astype(mxu_dtype).astype(jnp.float32)    # scatter operates at MXU precision
    seg = jax.ops.segment_sum(m1, col, num_segments=N)
    cnt = jax.ops.segment_sum(jnp.ones_like(col, jnp.float32), col,
                              num_segments=N)[:, None]
    agg = seg * (1.0 / jnp.maximum(cnt, 1.0))
    z2 = dot(x, p["w21a"]) + dot(agg, p["w21b"]) + p["b21"]
    z2 = _bn_train(z2, p["g2"], p["be2"])
    z2 = jnp.maximum(z2, 0.0)
    return dot(z2, p["w22"]) + p["b22"]


if __name__ == "__main__":
    N, E = 8, 16          # nodes, edges
    n_in, hidden = 4, 32  # NodeBlock(inputs=4, hidden=32)

    key = jax.random.PRNGKey(0)
    kx, kea, kei, kp = jax.random.split(key, 4)
    x = jax.random.normal(kx, (N, n_in), jnp.float32)
    edge_attr = jax.random.normal(kea, (E, hidden), jnp.float32)
    edge_index = jax.random.randint(kei, (2, E), 0, N, dtype=jnp.int32)
    params = init_params(kp, n_in, hidden)

    out = node_block_forward(x, edge_index, edge_attr, params, edge_block=8)
    out = jax.block_until_ready(out)
    assert out.shape == (N, hidden)

    # Primary correctness check: reference at the kernel's MXU precision (bf16
    # inputs, f32 accumulation) -- only accumulation-order differences remain.
    ref_bf16 = reference_forward(x, edge_index, edge_attr, params, mxu_dtype=jnp.bfloat16)
    assert jnp.allclose(out, ref_bf16, atol=2e-3, rtol=2e-3), "mismatch vs bf16-matched reference"

    # Sanity bound vs. the exact-f32 module (difference is pure bf16 MXU rounding).
    ref_f32 = reference_forward(x, edge_index, edge_attr, params, mxu_dtype=jnp.float32)
    assert float(jnp.max(jnp.abs(out - ref_f32))) < 0.25, "bf16 end-to-end error too large"

    print("KERNEL_OK")
</pallas_src>

<mosaic_0001>
module attributes {stable_mosaic.version = 11 : i64} {
  func.func @node_block_kernel(%arg0: i32, %arg1: i32, %arg2: memref<8x4xbf16, #tpu.memory_space<vmem>>, %arg3: memref<8x32xbf16, #tpu.memory_space<vmem>>, %arg4: memref<8x1xi32, #tpu.memory_space<vmem>>, %arg5: memref<8x1xi32, #tpu.memory_space<vmem>>, %arg6: memref<4x32xbf16, #tpu.memory_space<vmem>>, %arg7: memref<32x32xbf16, #tpu.memory_space<vmem>>, %arg8: memref<1x32xf32, #tpu.memory_space<vmem>>, %arg9: memref<1x32xf32, #tpu.memory_space<vmem>>, %arg10: memref<1x32xf32, #tpu.memory_space<vmem>>, %arg11: memref<32x32xbf16, #tpu.memory_space<vmem>>, %arg12: memref<1x32xf32, #tpu.memory_space<vmem>>, %arg13: memref<4x32xbf16, #tpu.memory_space<vmem>>, %arg14: memref<32x32xbf16, #tpu.memory_space<vmem>>, %arg15: memref<1x32xf32, #tpu.memory_space<vmem>>, %arg16: memref<1x32xf32, #tpu.memory_space<vmem>>, %arg17: memref<1x32xf32, #tpu.memory_space<vmem>>, %arg18: memref<32x32xbf16, #tpu.memory_space<vmem>>, %arg19: memref<1x32xf32, #tpu.memory_space<vmem>>, %arg20: memref<8x32xf32, #tpu.memory_space<vmem>>, %arg21: memref<1x32xf32, #tpu.memory_space<vmem>>, %arg22: memref<1x32xf32, #tpu.memory_space<vmem>>, %arg23: memref<8x32xf32, #tpu.memory_space<vmem>>, %arg24: memref<8x1xf32, #tpu.memory_space<vmem>>) attributes {dimension_semantics = [#tpu.dimension_semantics<arbitrary>, #tpu.dimension_semantics<arbitrary>], iteration_bounds = array<i64: 2, 2>, scalar_prefetch = 0 : i64, scratch_operands = 4 : i64, tpu.core_type = #tpu.core_type<tc>, window_params = [{pipeline_mode = #tpu.pipeline_mode<synchronous>, transform_indices = @transform_0, window_bounds = array<i64: 8, 4>}, {transform_indices = @transform_1, window_bounds = array<i64: 8, 32>}, {transform_indices = @transform_2, window_bounds = array<i64: 8, 1>}, {transform_indices = @transform_3, window_bounds = array<i64: 8, 1>}, {pipeline_mode = #tpu.pipeline_mode<synchronous>, transform_indices = @transform_4, window_bounds = array<i64: 4, 32>}, {pipeline_mode = #tpu.pipeline_mode<synchronous>, transform_indices = @transform_5, window_bounds = array<i64: 32, 32>}, {pipeline_mode = #tpu.pipeline_mode<synchronous>, transform_indices = @transform_6, window_bounds = array<i64: 1, 32>}, {pipeline_mode = #tpu.pipeline_mode<synchronous>, transform_indices = @transform_7, window_bounds = array<i64: 1, 32>}, {pipeline_mode = #tpu.pipeline_mode<synchronous>, transform_indices = @transform_8, window_bounds = array<i64: 1, 32>}, {pipeline_mode = #tpu.pipeline_mode<synchronous>, transform_indices = @transform_9, window_bounds = array<i64: 32, 32>}, {pipeline_mode = #tpu.pipeline_mode<synchronous>, transform_indices = @transform_10, window_bounds = array<i64: 1, 32>}, {pipeline_mode = #tpu.pipeline_mode<synchronous>, transform_indices = @transform_11, window_bounds = array<i64: 4, 32>}, {pipeline_mode = #tpu.pipeline_mode<synchronous>, transform_indices = @transform_12, window_bounds = array<i64: 32, 32>}, {pipeline_mode = #tpu.pipeline_mode<synchronous>, transform_indices = @transform_13, window_bounds = array<i64: 1, 32>}, {pipeline_mode = #tpu.pipeline_mode<synchronous>, transform_indices = @transform_14, window_bounds = array<i64: 1, 32>}, {pipeline_mode = #tpu.pipeline_mode<synchronous>, transform_indices = @transform_15, window_bounds = array<i64: 1, 32>}, {pipeline_mode = #tpu.pipeline_mode<synchronous>, transform_indices = @transform_16, window_bounds = array<i64: 32, 32>}, {pipeline_mode = #tpu.pipeline_mode<synchronous>, transform_indices = @transform_17, window_bounds = array<i64: 1, 32>}, {pipeline_mode = #tpu.pipeline_mode<synchronous>, transform_indices = @transform_18, window_bounds = array<i64: 8, 32>}]} {
    %c0_i32 = arith.constant 0 : i32
    %0 = arith.cmpi eq, %arg0, %c0_i32 : i32
    %c0_i32_0 = arith.constant 0 : i32
    %1 = arith.cmpi eq, %arg1, %c0_i32_0 : i32
    %2 = arith.andi %0, %1 : i1
    %3 = arith.extui %2 : i1 to i32
    %c0_i32_1 = arith.constant 0 : i32
    %4 = arith.cmpi ne, %3, %c0_i32_1 : i32
    scf.if %4 {
      %cst_23 = arith.constant 0.000000e+00 : f32
      %36 = vector.broadcast %cst_23 : f32 to vector<1x32xf32>
      %c0_24 = arith.constant 0 : index
      %c0_25 = arith.constant 0 : index
      %37 = vector.load %arg21[%c0_24, %c0_25] : memref<1x32xf32, #tpu.memory_space<vmem>>, vector<1x32xf32>
      tpu.vector_store %arg21[%c0_24, %c0_25], %36 {strides = array<i32>} : memref<1x32xf32, #tpu.memory_space<vmem>>, vector<1x32xf32>,
      %cst_26 = arith.constant 0.000000e+00 : f32
      %38 = vector.broadcast %cst_26 : f32 to vector<1x32xf32>
      %c0_27 = arith.constant 0 : index
      %c0_28 = arith.constant 0 : index
      %39 = vector.load %arg22[%c0_27, %c0_28] : memref<1x32xf32, #tpu.memory_space<vmem>>, vector<1x32xf32>
      tpu.vector_store %arg22[%c0_27, %c0_28], %38 {strides = array<i32>} : memref<1x32xf32, #tpu.memory_space<vmem>>, vector<1x32xf32>,
      %cst_29 = arith.constant 0.000000e+00 : f32
      %40 = vector.broadcast %cst_29 : f32 to vector<8x32xf32>
      %c0_30 = arith.constant 0 : index
      %c0_31 = arith.constant 0 : index
      %41 = vector.load %arg23[%c0_30, %c0_31] : memref<8x32xf32, #tpu.memory_space<vmem>>, vector<8x32xf32>
      tpu.vector_store %arg23[%c0_30, %c0_31], %40 {strides = array<i32>} : memref<8x32xf32, #tpu.memory_space<vmem>>, vector<8x32xf32>,
      %cst_32 = arith.constant 0.000000e+00 : f32
      %42 = vector.broadcast %cst_32 : f32 to vector<8x1xf32>
      %c0_33 = arith.constant 0 : index
      %c0_34 = arith.constant 0 : index
      %43 = vector.load %arg24[%c0_33, %c0_34] : memref<8x1xf32, #tpu.memory_space<vmem>>, vector<8x1xf32>
      tpu.vector_store %arg24[%c0_33, %c0_34], %42 {strides = array<i32>} : memref<8x1xf32, #tpu.memory_space<vmem>>, vector<8x1xf32>,
    } else {
    }
    %c0 = arith.constant 0 : index
    %c0_2 = arith.constant 0 : index
    %5 = vector.load %arg4[%c0, %c0_2] : memref<8x1xi32, #tpu.memory_space<vmem>>, vector<8x1xi32>
    %6 = tpu.iota {dimensions = array<i32: 1>} : vector<8x8xi32>
    %7 = vector.broadcast %5 : vector<8x1xi32> to vector<8x8xi32>
    %8 = arith.cmpi eq, %6, %7 : vector<8x8xi32>
    %cst = arith.constant 1.000000e+00 : f32
    %cst_3 = arith.constant 0.000000e+00 : f32
    %9 = vector.broadcast %cst : f32 to vector<8x8xf32>
    %10 = vector.broadcast %cst_3 : f32 to vector<8x8xf32>
    %11 = arith.select %8, %9, %10 : vector<8x8xi1>, vector<8x8xf32>
    %12 = arith.truncf %11 : vector<8x8xf32> to vector<8x8xbf16>
    %c0_4 = arith.constant 0 : index
    %c0_5 = arith.constant 0 : index
    %13 = vector.load %arg2[%c0_4, %c0_5] : memref<8x4xbf16, #tpu.memory_space<vmem>>, vector<8x4xbf16>
    %cst_6 = arith.constant dense<0.000000e+00> : vector<8x4xf32>
    %14 = tpu.matmul %12, %13, %cst_6 {dimension_numbers = #tpu.dot_dimension_numbers<[1], [0], [0], [1], [0, 0, 1, 1], [], []>} : vector<8x8xbf16>, vector<8x4xbf16>, vector<8x4xf32> -> vector<8x4xf32>
    %15 = arith.truncf %14 : vector<8x4xf32> to vector<8x4xbf16>
    %c0_7 = arith.constant 0 : index
    %c0_8 = arith.constant 0 : index
    %16 = vector.load %arg6[%c0_7, %c0_8] : memref<4x32xbf16, #tpu.memory_space<vmem>>, vector<4x32xbf16>
    %cst_9 = arith.constant dense<0.000000e+00> : vector<8x32xf32>
    %17 = tpu.matmul %15, %16, %cst_9 {dimension_numbers = #tpu.dot_dimension_numbers<[1], [0], [0], [1], [0, 0, 1, 1], [], []>} : vector<8x4xbf16>, vector<4x32xbf16>, vector<8x32xf32> -> vector<8x32xf32>
    %c0_10 = arith.constant 0 : index
    %c0_11 = arith.constant 0 : index
    %18 = vector.load %arg3[%c0_10, %c0_11] : memref<8x32xbf16, #tpu.memory_space<vmem>>, vector<8x32xbf16>
    %c0_12 = arith.constant 0 : index
    %c0_13 = arith.constant 0 : index
    %19 = vector.load %arg7[%c0_12, %c0_13] : memref<32x32xbf16, #tpu.memory_space<vmem>>, vector<32x32xbf16>
    %cst_14 = arith.constant dense<0.000000e+00> : vector<8x32xf32>
    %20 = tpu.matmul %18, %19, %cst_14 {dimension_numbers = #tpu.dot_dimension_numbers<[1], [0], [0], [1], [0, 0, 1, 1], [], []>} : vector<8x32xbf16>, vector<32x32xbf16>, vector<8x32xf32> -> vector<8x32xf32>
    %21 = arith.addf %17, %20 : vector<8x32xf32>
    %c0_15 = arith.constant 0 : index
    %c0_16 = arith.constant 0 : index
    %22 = vector.load %arg8[%c0_15, %c0_16] : memref<1x32xf32, #tpu.memory_space<vmem>>, vector<1x32xf32>
    %23 = vector.broadcast %22 : vector<1x32xf32> to vector<8x32xf32>
    %24 = arith.addf %21, %23 : vector<8x32xf32>
    %c0_i32_17 = arith.constant 0 : i32
    %25 = arith.cmpi eq, %arg0, %c0_i32_17 : i32
    %26 = arith.extui %25 : i1 to i32
    %c0_i32_18 = arith.constant 0 : i32
    %27 = arith.cmpi ne, %26, %c0_i32_18 : i32
    scf.if %27 {
      %c0_23 = arith.constant 0 : index
      %c0_24 = arith.constant 0 : index
      %36 = vector.load %arg21[%c0_23, %c0_24] : memref<1x32xf32, #tpu.memory_space<vmem>>, vector<1x32xf32>
      %cst_25 = arith.constant dense<0.000000e+00> : vector<32xf32>
      %37 = vector.multi_reduction <add>, %24, %cst_25 [0] : vector<8x32xf32> to vector<32xf32>
      %38 = vector.shape_cast %37 : vector<32xf32> to vector<1x32xf32>
      %39 = arith.addf %36, %38 : vector<1x32xf32>
      %c0_26 = arith.constant 0 : index
      %c0_27 = arith.constant 0 : index
      %40 = vector.load %arg21[%c0_26, %c0_27] : memref<1x32xf32, #tpu.memory_space<vmem>>, vector<1x32xf32>
      tpu.vector_store %arg21[%c0_26, %c0_27], %39 {strides = array<i32>} : memref<1x32xf32, #tpu.memory_space<vmem>>, vector<1x32xf32>,
      %c0_28 = arith.constant 0 : index
      %c0_29 = arith.constant 0 : index
      %41 = vector.load %arg22[%c0_28, %c0_29] : memref<1x32xf32, #tpu.memory_space<vmem>>, vector<1x32xf32>
      %42 = arith.mulf %24, %24 : vector<8x32xf32>
      %cst_30 = arith.constant dense<0.000000e+00> : vector<32xf32>
      %43 = vector.multi_reduction <add>, %42, %cst_30 [0] : vector<8x32xf32> to vector<32xf32>
      %44 = vector.shape_cast %43 : vector<32xf32> to vector<1x32xf32>
      %45 = arith.addf %41, %44 : vector<1x32xf32>
      %c0_31 = arith.constant 0 : index
      %c0_32 = arith.constant 0 : index
      %46 = vector.load %arg22[%c0_31, %c0_32] : memref<1x32xf32, #tpu.memory_space<vmem>>, vector<1x32xf32>
      tpu.vector_store %arg22[%c0_31, %c0_32], %45 {strides = array<i32>} : memref<1x32xf32, #tpu.memory_space<vmem>>, vector<1x32xf32>,
    } else {
    }
    %c1_i32 = arith.constant 1 : i32
    %28 = arith.cmpi eq, %arg0, %c1_i32 : i32
    %29 = arith.extui %28 : i1 to i32
    %c0_i32_19 = arith.constant 0 : i32
    %30 = arith.cmpi ne, %29, %c0_i32_19 : i32
    scf.if %30 {
      %c0_23 = arith.constant 0 : index
      %c0_24 = arith.constant 0 : index
      %36 = vector.load %arg21[%c0_23, %c0_24] : memref<1x32xf32, #tpu.memory_space<vmem>>, vector<1x32xf32>
      %cst_25 = arith.constant 6.250000e-02 : f32
      %37 = vector.broadcast %cst_25 : f32 to vector<1x32xf32>
      %38 = arith.mulf %36, %37 : vector<1x32xf32>
      %c0_26 = arith.constant 0 : index
      %c0_27 = arith.constant 0 : index
      %39 = vector.load %arg22[%c0_26, %c0_27] : memref<1x32xf32, #tpu.memory_space<vmem>>, vector<1x32xf32>
      %cst_28 = arith.constant 6.250000e-02 : f32
      %40 = vector.broadcast %cst_28 : f32 to vector<1x32xf32>
      %41 = arith.mulf %39, %40 : vector<1x32xf32>
      %42 = arith.mulf %38, %38 : vector<1x32xf32>
      %43 = arith.subf %41, %42 : vector<1x32xf32>
      %cst_29 = arith.constant 0.000000e+00 : f32
      %44 = vector.broadcast %cst_29 : f32 to vector<1x32xf32>
      %45 = arith.maximumf %43, %44 : vector<1x32xf32>
      %46 = vector.broadcast %38 : vector<1x32xf32> to vector<8x32xf32>
      %47 = arith.subf %24, %46 : vector<8x32xf32>
      %cst_30 = arith.constant 9.99999974E-6 : f32
      %48 = vector.broadcast %cst_30 : f32 to vector<1x32xf32>
      %49 = arith.addf %45, %48 : vector<1x32xf32>
      %50 = math.rsqrt %49 : vector<1x32xf32>
      %51 = vector.broadcast %50 : vector<1x32xf32> to vector<8x32xf32>
      %52 = arith.mulf %47, %51 : vector<8x32xf32>
      %c0_31 = arith.constant 0 : index
      %c0_32 = arith.constant 0 : index
      %53 = vector.load %arg9[%c0_31, %c0_32] : memref<1x32xf32, #tpu.memory_space<vmem>>, vector<1x32xf32>
      %54 = vector.broadcast %53 : vector<1x32xf32> to vector<8x32xf32>
      %55 = arith.mulf %52, %54 : vector<8x32xf32>
      %c0_33 = arith.constant 0 : index
      %c0_34 = arith.constant 0 : index
      %56 = vector.load %arg10[%c0_33, %c0_34] : memref<1x32xf32, #tpu.memory_space<vmem>>, vector<1x32xf32>
      %57 = vector.broadcast %56 : vector<1x32xf32> to vector<8x32xf32>
      %58 = arith.addf %55, %57 : vector<8x32xf32>
      %cst_35 = arith.constant 0.000000e+00 : f32
      %59 = vector.broadcast %cst_35 : f32 to vector<8x32xf32>
      %60 = arith.maximumf %58, %59 : vector<8x32xf32>
      %61 = arith.truncf %60 : vector<8x32xf32> to vector<8x32xbf16>
      %c0_36 = arith.constant 0 : index
      %c0_37 = arith.constant 0 : index
      %62 = vector.load %arg11[%c0_36, %c0_37] : memref<32x32xbf16, #tpu.memory_space<vmem>>, vector<32x32xbf16>
      %cst_38 = arith.constant dense<0.000000e+00> : vector<8x32xf32>
      %63 = tpu.matmul %61, %62, %cst_38 {dimension_numbers = #tpu.dot_dimension_numbers<[1], [0], [0], [1], [0, 0, 1, 1], [], []>} : vector<8x32xbf16>, vector<32x32xbf16>, vector<8x32xf32> -> vector<8x32xf32>
      %c0_39 = arith.constant 0 : index
      %c0_40 = arith.constant 0 : index
      %64 = vector.load %arg12[%c0_39, %c0_40] : memref<1x32xf32, #tpu.memory_space<vmem>>, vector<1x32xf32>
      %65 = vector.broadcast %64 : vector<1x32xf32> to vector<8x32xf32>
      %66 = arith.addf %63, %65 : vector<8x32xf32>
      %c0_41 = arith.constant 0 : index
      %c0_42 = arith.constant 0 : index
      %67 = vector.load %arg5[%c0_41, %c0_42] : memref<8x1xi32, #tpu.memory_space<vmem>>, vector<8x1xi32>
      %68 = tpu.iota {dimensions = array<i32: 1>} : vector<8x8xi32>
      %69 = vector.broadcast %67 : vector<8x1xi32> to vector<8x8xi32>
      %70 = arith.cmpi eq, %68, %69 : vector<8x8xi32>
      %cst_43 = arith.constant 1.000000e+00 : f32
      %cst_44 = arith.constant 0.000000e+00 : f32
      %71 = vector.broadcast %cst_43 : f32 to vector<8x8xf32>
      %72 = vector.broadcast %cst_44 : f32 to vector<8x8xf32>
      %73 = arith.select %70, %71, %72 : vector<8x8xi1>, vector<8x8xf32>
      %74 = arith.truncf %73 : vector<8x8xf32> to vector<8x8xbf16>
      %c0_45 = arith.constant 0 : index
      %c0_46 = arith.constant 0 : index
      %75 = vector.load %arg23[%c0_45, %c0_46] : memref<8x32xf32, #tpu.memory_space<vmem>>, vector<8x32xf32>
      %76 = arith.truncf %66 : vector<8x32xf32> to vector<8x32xbf16>
      %cst_47 = arith.constant dense<0.000000e+00> : vector<8x32xf32>
      %77 = tpu.matmul %74, %76, %cst_47 {dimension_numbers = #tpu.dot_dimension_numbers<[0], [0], [1], [1], [0, 1, 1, 1], [], []>} : vector<8x8xbf16>, vector<8x32xbf16>, vector<8x32xf32> -> vector<8x32xf32>
      %78 = arith.addf %75, %77 : vector<8x32xf32>
      %c0_48 = arith.constant 0 : index
      %c0_49 = arith.constant 0 : index
      %79 = vector.load %arg23[%c0_48, %c0_49] : memref<8x32xf32, #tpu.memory_space<vmem>>, vector<8x32xf32>
      tpu.vector_store %arg23[%c0_48, %c0_49], %78 {strides = array<i32>} : memref<8x32xf32, #tpu.memory_space<vmem>>, vector<8x32xf32>,
      %c0_50 = arith.constant 0 : index
      %c0_51 = arith.constant 0 : index
      %80 = vector.load %arg24[%c0_50, %c0_51] : memref<8x1xf32, #tpu.memory_space<vmem>>, vector<8x1xf32>
      %cst_52 = arith.constant 1.000000e+00 : bf16
      %81 = vector.broadcast %cst_52 : bf16 to vector<8x1xbf16>
      %cst_53 = arith.constant dense<0.000000e+00> : vector<8x1xf32>
      %82 = tpu.matmul %74, %81, %cst_53 {dimension_numbers = #tpu.dot_dimension_numbers<[0], [0], [1], [1], [0, 1, 1, 1], [], []>} : vector<8x8xbf16>, vector<8x1xbf16>, vector<8x1xf32> -> vector<8x1xf32>
      %83 = arith.addf %80, %82 : vector<8x1xf32>
      %c0_54 = arith.constant 0 : index
      %c0_55 = arith.constant 0 : index
      %84 = vector.load %arg24[%c0_54, %c0_55] : memref<8x1xf32, #tpu.memory_space<vmem>>, vector<8x1xf32>
      tpu.vector_store %arg24[%c0_54, %c0_55], %83 {strides = array<i32>} : memref<8x1xf32, #tpu.memory_space<vmem>>, vector<8x1xf32>,
    } else {
    }
    %c1_i32_20 = arith.constant 1 : i32
    %31 = arith.cmpi eq, %arg0, %c1_i32_20 : i32
    %c1_i32_21 = arith.constant 1 : i32
    %32 = arith.cmpi eq, %arg1, %c1_i32_21 : i32
    %33 = arith.andi %31, %32 : i1
    %34 = arith.extui %33 : i1 to i32
    %c0_i32_22 = arith.constant 0 : i32
    %35 = arith.cmpi ne, %34, %c0_i32_22 : i32
    scf.if %35 {
      %c0_23 = arith.constant 0 : index
      %c0_24 = arith.constant 0 : index
      %36 = vector.load %arg24[%c0_23, %c0_24] : memref<8x1xf32, #tpu.memory_space<vmem>>, vector<8x1xf32>
      %cst_25 = arith.constant 1.000000e+00 : f32
      %37 = vector.broadcast %cst_25 : f32 to vector<8x1xf32>
      %38 = arith.maximumf %36, %37 : vector<8x1xf32>
      %39 = tpu.reciprocal %38 : vector<8x1xf32> -> vector<8x1xf32>
      %c0_26 = arith.constant 0 : index
      %c0_27 = arith.constant 0 : index
      %40 = vector.load %arg23[%c0_26, %c0_27] : memref<8x32xf32, #tpu.memory_space<vmem>>, vector<8x32xf32>
      %41 = vector.broadcast %39 : vector<8x1xf32> to vector<8x32xf32>
      %42 = arith.mulf %40, %41 : vector<8x32xf32>
      %c0_28 = arith.constant 0 : index
      %c0_29 = arith.constant 0 : index
      %43 = vector.load %arg2[%c0_28, %c0_29] : memref<8x4xbf16, #tpu.memory_space<vmem>>, vector<8x4xbf16>
      %c0_30 = arith.constant 0 : index
      %c0_31 = arith.constant 0 : index
      %44 = vector.load %arg13[%c0_30, %c0_31] : memref<4x32xbf16, #tpu.memory_space<vmem>>, vector<4x32xbf16>
      %cst_32 = arith.constant dense<0.000000e+00> : vector<8x32xf32>
      %45 = tpu.matmul %43, %44, %cst_32 {dimension_numbers = #tpu.dot_dimension_numbers<[1], [0], [0], [1], [0, 0, 1, 1], [], []>} : vector<8x4xbf16>, vector<4x32xbf16>, vector<8x32xf32> -> vector<8x32xf32>
      %46 = arith.truncf %42 : vector<8x32xf32> to vector<8x32xbf16>
      %c0_33 = arith.constant 0 : index
      %c0_34 = arith.constant 0 : index
      %47 = vector.load %arg14[%c0_33, %c0_34] : memref<32x32xbf16, #tpu.memory_space<vmem>>, vector<32x32xbf16>
      %cst_35 = arith.constant dense<0.000000e+00> : vector<8x32xf32>
      %48 = tpu.matmul %46, %47, %cst_35 {dimension_numbers = #tpu.dot_dimension_numbers<[1], [0], [0], [1], [0, 0, 1, 1], [], []>} : vector<8x32xbf16>, vector<32x32xbf16>, vector<8x32xf32> -> vector<8x32xf32>
      %49 = arith.addf %45, %48 : vector<8x32xf32>
      %c0_36 = arith.constant 0 : index
      %c0_37 = arith.constant 0 : index
      %50 = vector.load %arg15[%c0_36, %c0_37] : memref<1x32xf32, #tpu.memory_space<vmem>>, vector<1x32xf32>
      %51 = vector.broadcast %50 : vector<1x32xf32> to vector<8x32xf32>
      %52 = arith.addf %49, %51 : vector<8x32xf32>
      %cst_38 = arith.constant dense<0.000000e+00> : vector<32xf32>
      %53 = vector.multi_reduction <add>, %52, %cst_38 [0] : vector<8x32xf32> to vector<32xf32>
      %54 = vector.shape_cast %53 : vector<32xf32> to vector<1x32xf32>
      %cst_39 = arith.constant 8.000000e+00 : f32
      %55 = vector.broadcast %cst_39 : f32 to vector<1x32xf32>
      %56 = arith.divf %54, %55 : vector<1x32xf32>
      %57 = vector.broadcast %56 : vector<1x32xf32> to vector<8x32xf32>
      %58 = arith.subf %52, %57 : vector<8x32xf32>
      %59 = arith.mulf %58, %58 : vector<8x32xf32>
      %cst_40 = arith.constant dense<0.000000e+00> : vector<32xf32>
      %60 = vector.multi_reduction <add>, %59, %cst_40 [0] : vector<8x32xf32> to vector<32xf32>
      %61 = vector.shape_cast %60 : vector<32xf32> to vector<1x32xf32>
      %cst_41 = arith.constant 8.000000e+00 : f32
      %62 = vector.broadcast %cst_41 : f32 to vector<1x32xf32>
      %63 = arith.divf %61, %62 : vector<1x32xf32>
      %64 = vector.broadcast %56 : vector<1x32xf32> to vector<8x32xf32>
      %65 = arith.subf %52, %64 : vector<8x32xf32>
      %cst_42 = arith.constant 9.99999974E-6 : f32
      %66 = vector.broadcast %cst_42 : f32 to vector<1x32xf32>
      %67 = arith.addf %63, %66 : vector<1x32xf32>
      %68 = math.rsqrt %67 : vector<1x32xf32>
      %69 = vector.broadcast %68 : vector<1x32xf32> to vector<8x32xf32>
      %70 = arith.mulf %65, %69 : vector<8x32xf32>
      %c0_43 = arith.constant 0 : index
      %c0_44 = arith.constant 0 : index
      %71 = vector.load %arg16[%c0_43, %c0_44] : memref<1x32xf32, #tpu.memory_space<vmem>>, vector<1x32xf32>
      %72 = vector.broadcast %71 : vector<1x32xf32> to vector<8x32xf32>
      %73 = arith.mulf %70, %72 : vector<8x32xf32>
      %c0_45 = arith.constant 0 : index
      %c0_46 = arith.constant 0 : index
      %74 = vector.load %arg17[%c0_45, %c0_46] : memref<1x32xf32, #tpu.memory_space<vmem>>, vector<1x32xf32>
      %75 = vector.broadcast %74 : vector<1x32xf32> to vector<8x32xf32>
      %76 = arith.addf %73, %75 : vector<8x32xf32>
      %cst_47 = arith.constant 0.000000e+00 : f32
      %77 = vector.broadcast %cst_47 : f32 to vector<8x32xf32>
      %78 = arith.maximumf %76, %77 : vector<8x32xf32>
      %79 = arith.truncf %78 : vector<8x32xf32> to vector<8x32xbf16>
      %c0_48 = arith.constant 0 : index
      %c0_49 = arith.constant 0 : index
      %80 = vector.load %arg18[%c0_48, %c0_49] : memref<32x32xbf16, #tpu.memory_space<vmem>>, vector<32x32xbf16>
      %cst_50 = arith.constant dense<0.000000e+00> : vector<8x32xf32>
      %81 = tpu.matmul %79, %80, %cst_50 {dimension_numbers = #tpu.dot_dimension_numbers<[1], [0], [0], [1], [0, 0, 1, 1], [], []>} : vector<8x32xbf16>, vector<32x32xbf16>, vector<8x32xf32> -> vector<8x32xf32>
      %c0_51 = arith.constant 0 : index
      %c0_52 = arith.constant 0 : index
      %82 = vector.load %arg19[%c0_51, %c0_52] : memref<1x32xf32, #tpu.memory_space<vmem>>, vector<1x32xf32>
      %83 = vector.broadcast %82 : vector<1x32xf32> to vector<8x32xf32>
      %84 = arith.addf %81, %83 : vector<8x32xf32>
      %c0_53 = arith.constant 0 : index
      %c0_54 = arith.constant 0 : index
      %85 = vector.load %arg20[%c0_53, %c0_54] : memref<8x32xf32, #tpu.memory_space<vmem>>, vector<8x32xf32>
      tpu.vector_store %arg20[%c0_53, %c0_54], %84 {strides = array<i32>} : memref<8x32xf32, #tpu.memory_space<vmem>>, vector<8x32xf32>,
    } else {
    }
    return
  }
  func.func @transform_0(%arg0: i32, %arg1: i32) -> (i32, i32) {
    %c0_i32 = arith.constant 0 : i32
    %c0_i32_0 = arith.constant 0 : i32
    %c0_i32_1 = arith.constant 0 : i32
    return %c0_i32, %c0_i32_0 : i32, i32
  }
  func.func @transform_1(%arg0: i32, %arg1: i32) -> (i32, i32) {
    %c0_i32 = arith.constant 0 : i32
    %c0_i32_0 = arith.constant 0 : i32
    return %arg1, %c0_i32 : i32, i32
  }
  func.func @transform_2(%arg0: i32, %arg1: i32) -> (i32, i32) {
    %c0_i32 = arith.constant 0 : i32
    %c0_i32_0 = arith.constant 0 : i32
    return %arg1, %c0_i32 : i32, i32
  }
  func.func @transform_3(%arg0: i32, %arg1: i32) -> (i32, i32) {
    %c0_i32 = arith.constant 0 : i32
    %c0_i32_0 = arith.constant 0 : i32
    return %arg1, %c0_i32 : i32, i32
  }
  func.func @transform_4(%arg0: i32, %arg1: i32) -> (i32, i32) {
    %c0_i32 = arith.constant 0 : i32
    %c0_i32_0 = arith.constant 0 : i32
    %c0_i32_1 = arith.constant 0 : i32
    return %c0_i32, %c0_i32_0 : i32, i32
  }
  func.func @transform_5(%arg0: i32, %arg1: i32) -> (i32, i32) {
    %c0_i32 = arith.constant 0 : i32
    %c0_i32_0 = arith.constant 0 : i32
    %c0_i32_1 = arith.constant 0 : i32
    return %c0_i32, %c0_i32_0 : i32, i32
  }
  func.func @transform_6(%arg0: i32, %arg1: i32) -> (i32, i32) {
    %c0_i32 = arith.constant 0 : i32
    %c0_i32_0 = arith.constant 0 : i32
    %c0_i32_1 = arith.constant 0 : i32
    return %c0_i32, %c0_i32_0 : i32, i32
  }
  func.func @transform_7(%arg0: i32, %arg1: i32) -> (i32, i32) {
    %c0_i32 = arith.constant 0 : i32
    %c0_i32_0 = arith.constant 0 : i32
    %c0_i32_1 = arith.constant 0 : i32
    return %c0_i32, %c0_i32_0 : i32, i32
  }
  func.func @transform_8(%arg0: i32, %arg1: i32) -> (i32, i32) {
    %c0_i32 = arith.constant 0 : i32
    %c0_i32_0 = arith.constant 0 : i32
    %c0_i32_1 = arith.constant 0 : i32
    return %c0_i32, %c0_i32_0 : i32, i32
  }
  func.func @transform_9(%arg0: i32, %arg1: i32) -> (i32, i32) {
    %c0_i32 = arith.constant 0 : i32
    %c0_i32_0 = arith.constant 0 : i32
    %c0_i32_1 = arith.constant 0 : i32
    return %c0_i32, %c0_i32_0 : i32, i32
  }
  func.func @transform_10(%arg0: i32, %arg1: i32) -> (i32, i32) {
    %c0_i32 = arith.constant 0 : i32
    %c0_i32_0 = arith.constant 0 : i32
    %c0_i32_1 = arith.constant 0 : i32
    return %c0_i32, %c0_i32_0 : i32, i32
  }
  func.func @transform_11(%arg0: i32, %arg1: i32) -> (i32, i32) {
    %c0_i32 = arith.constant 0 : i32
    %c0_i32_0 = arith.constant 0 : i32
    %c0_i32_1 = arith.constant 0 : i32
    return %c0_i32, %c0_i32_0 : i32, i32
  }
  func.func @transform_12(%arg0: i32, %arg1: i32) -> (i32, i32) {
    %c0_i32 = arith.constant 0 : i32
    %c0_i32_0 = arith.constant 0 : i32
    %c0_i32_1 = arith.constant 0 : i32
    return %c0_i32, %c0_i32_0 : i32, i32
  }
  func.func @transform_13(%arg0: i32, %arg1: i32) -> (i32, i32) {
    %c0_i32 = arith.constant 0 : i32
    %c0_i32_0 = arith.constant 0 : i32
    %c0_i32_1 = arith.constant 0 : i32
    return %c0_i32, %c0_i32_0 : i32, i32
  }
  func.func @transform_14(%arg0: i32, %arg1: i32) -> (i32, i32) {
    %c0_i32 = arith.constant 0 : i32
    %c0_i32_0 = arith.constant 0 : i32
    %c0_i32_1 = arith.constant 0 : i32
    return %c0_i32, %c0_i32_0 : i32, i32
  }
  func.func @transform_15(%arg0: i32, %arg1: i32) -> (i32, i32) {
    %c0_i32 = arith.constant 0 : i32
    %c0_i32_0 = arith.constant 0 : i32
    %c0_i32_1 = arith.constant 0 : i32
    return %c0_i32, %c0_i32_0 : i32, i32
  }
  func.func @transform_16(%arg0: i32, %arg1: i32) -> (i32, i32) {
    %c0_i32 = arith.constant 0 : i32
    %c0_i32_0 = arith.constant 0 : i32
    %c0_i32_1 = arith.constant 0 : i32
    return %c0_i32, %c0_i32_0 : i32, i32
  }
  func.func @transform_17(%arg0: i32, %arg1: i32) -> (i32, i32) {
    %c0_i32 = arith.constant 0 : i32
    %c0_i32_0 = arith.constant 0 : i32
    %c0_i32_1 = arith.constant 0 : i32
    return %c0_i32, %c0_i32_0 : i32, i32
  }
  func.func @transform_18(%arg0: i32, %arg1: i32) -> (i32, i32) {
    %c0_i32 = arith.constant 0 : i32
    %c0_i32_0 = arith.constant 0 : i32
    %c0_i32_1 = arith.constant 0 : i32
    return %c0_i32, %c0_i32_0 : i32, i32
  }
}

</mosaic_0001>

<bundles_post_ra>
// kernel: tpu_custom_call.1
= control target key start
LH: loop header
LB: loop body
LE: loop exit
PB: predicated region body
PF: predicated region fallthrough
CT: control target
= control target key end

     0   :  { %s2349_s0 = inlined_call_operand.vmem [shape: bf16[8,4], index: 0, kind: input, shape index: {}]   ;;  %s2350_s1 = inlined_call_operand.hbm [shape: bf16[16,32], index: 1, kind: input, shape index: {}]   ;;  %s2351_s2 = inlined_call_operand.vmem [shape: s32[16,1], index: 2, kind: input, shape index: {}]   ;;  %s2352_s3 = inlined_call_operand.vmem [shape: s32[16,1], index: 3, kind: input, shape index: {}]   ;;  %s2353_s4 = inlined_call_operand.vmem [shape: bf16[4,32], index: 4, kind: input, shape index: {}]   ;;  %s2354_s5 = inlined_call_operand.vmem [shape: bf16[32,32], index: 5, kind: input, shape index: {}]   ;;  %s2355_s6 = inlined_call_operand.hbm [shape: f32[1,32], index: 6, kind: input, shape index: {}]   ;;  %s2356_s7 = inlined_call_operand.hbm [shape: f32[1,32], index: 7, kind: input, shape index: {}]   ;;  %s2357_s8 = inlined_call_operand.vmem [shape: f32[1,32], index: 8, kind: input, shape index: {}]   ;;  %s2358_s9 = inlined_call_operand.vmem [shape: bf16[32,32], index: 9, kind: input, shape index: {}]   ;;  %s2359_s10 = inlined_call_operand.vmem [shape: f32[1,32], index: 10, kind: input, shape index: {}]   ;;  %s2360_s11 = inlined_call_operand.vmem [shape: bf16[4,32], index: 11, kind: input, shape index: {}]   ;;  %s2361_s12 = inlined_call_operand.vmem [shape: bf16[32,32], index: 12, kind: input, shape index: {}]   ;;  %s2362_s13 = inlined_call_operand.vmem [shape: f32[1,32], index: 13, kind: input, shape index: {}]   ;;  %s2363_s14 = inlined_call_operand.vmem [shape: f32[1,32], index: 14, kind: input, shape index: {}]   ;;  %s2364_s15 = inlined_call_operand.vmem [shape: f32[1,32], index: 15, kind: input, shape index: {}]   ;;  %s2365_s16 = inlined_call_operand.vmem [shape: bf16[32,32], index: 16, kind: input, shape index: {}]   ;;  %s2366_s17 = inlined_call_operand.vmem [shape: f32[1,32], index: 17, kind: input, shape index: {}]   ;;  %s2367_s18 = inlined_call_operand.hbm [shape: f32[8,32], index: 18, kind: output, shape index: {}]  }
   0x1   :  { %2377 = sst [smem:[#allocation18_spill]] %s2349_s0 }
   0x2   :  { %2378 = sst [smem:[#allocation19_spill]] %s2350_s1 }
   0x3   :  { %2379 = sst [smem:[#allocation20_spill]] %s2351_s2 }
   0x4   :  { %2380 = sst [smem:[#allocation21_spill]] %s2355_s6 }
   0x5   :  { %2381 = sst [smem:[#allocation22_spill]] %s2356_s7 }
   0x6   :  { %2382 = sst [smem:[#allocation23_spill]] %s2360_s11 }
   0x7   :  { %2383 = sst [smem:[#allocation24_spill]] %s2362_s13 }
   0x8   :  { %2384 = sst [smem:[#allocation25_spill]] %s2363_s14 }
   0x9   :  { %2385 = sst [smem:[#allocation26_spill]] %s2364_s15 }
   0xa   :  { %2386 = sst [smem:[#allocation27_spill]] %s2365_s16 }
   0xb   :  { %2387 = sst [smem:[#allocation28_spill]] %s2366_s17 }
   0xc   :  { %2388 = sst [smem:[#allocation29_spill]] %s2367_s18 }
   0xd   :  { %23 = vsyncpa [#allocation7], 0 }
   0xe   :  { %25 = vsyncpa [#allocation7 + $0x1], 0 }
   0xf   :  { %26 = vsyncpa [#allocation10], 0 }
  0x10   :  { %27 = vsyncpa [#allocation8], 0  ;;  %s1999_s27 = smov 0   ;;  %s2001_s28 = smov 0  }
  0x11   :  { %s2003_s29 = smov 0   ;;  %s2005_s30 = smov 0  }
  0x12   :  { %s2007_s0 = smov 0   ;;  %s2009_s19 = smov 0  }
  0x13   :  { %s2011_s1 = smov 0   ;;  %s2013_s20 = smov 0  }
  0x14 LB: > { %s2369_s21 = sadd.s32 4294967295, %s1888_s20   ;;  %p86_p0 = scmp.ne.s32.totalorder %s1864_s28, %s1860_s27  ;;  %s1888_s20 = sphi %s2013_s20, %s33_s20   ;;  %s1884_s1 = sphi %s2011_s1, %s2424_s1   ;;  %s1880_s19 = sphi %s2009_s19, %s2423_s19   ;;  %s1876_s0 = sphi %s2007_s0, %s2422_s0   ;;  %s1872_s30 = sphi %s2005_s30, %s2421_s30   ;;  %s1868_s29 = sphi %s2003_s29, %s2420_s29   ;;  %s1864_s28 = sphi %s2001_s28, %s2419_s28   ;;  %s1860_s27 = sphi %s1999_s27, %s2418_s27  }
  0x15   : > { %p2041_p1 = scmp.eq.s32.totalorder %s2369_s21, 0  ;;  %p1449_p2 = scmp.ge.s32.totalorder %s1888_s20, 1 }
  0x16   : > { %p464_p3 = scmp.lt.s32.totalorder %s1888_s20, 5  ;;  %s1890_s24 = smov [#allocation9]  }
  0x17   : > { %s2389_s22 = scalar_select %p2041_p1, 1, 0 }
  0x18   : > { %p2049_p4 = por %p2041_p1, %p86_p0  ;;  %p2053_p5 = pnand %p1449_p2, %p464_p3 }
  0x19   : > { %s486_s25 = sshll.u32 %s1890_s24, 4  ;;  %s1891_s26 = smov [#allocation11]   ;;  %s487_s25 = int_to_ptr.vmem [resolvable:$true] %s486_s25 }
  0x1a   : > { %s2390_s2 = scalar_select %p2049_p4, 1, 0 }
  0x1b   : > { %s2391_s23 = scalar_select %p2053_p5, 1, 0 }
  0x1c   : > { %p1590_p6 = pneg %p2053_p5  ;;  %s497_s27 = sshll.u32 %s1891_s26, 4  ;;  %s2065_s27 = int_to_ptr.vmem [resolvable:$true] %s497_s27 }
  0x1d   : > { %s2393_s6 = sld [smem:[#allocation21_spill]] }
  0x1e   : > { %p2061_p7 = pnand %p1590_p6, %p2041_p1 }
  0x20   : > { %p1704_p9 = pneg %p2061_p7 }
  0x23   : > { %s1702_s15 = scalar_lea.hbm %s2393_s6, 16 }
  0x24   : > { %p1703_p8 = scmp.ne.s32.totalorder %s2393_s6, %s1702_s15  ;;  %p1709_p12 = scmp.lt.u32.totalorder %s1702_s15, %s2393_s6 }
  0x26   : > { %p1705_p10 = pnand %p1704_p9, %p1703_p8 }
  0x28   : > { %p1706_p11 = pneg %p1705_p10 }
  0x2a   : > { %p1711_p13 = pnand %p1709_p12, %p1706_p11 }
  0x2c   : > { %1714 = shalt.err (!%p1711_p13)
}
  0x2d   : > { %s1715_s16 = scalar_lea.vmem %s487_s25, 16  ;;  %s1722_s14 = scalar_lea.vmem %s487_s25, 32 }
  0x2e   : > { %p1716_p0 = scmp.ne.s32.totalorder %s487_s25, %s1715_s16  ;;  %p1723_p6 = scmp.lt.s32.totalorder %s487_s25, %s487_s25 }
  0x2f   : > { %p1724_p1 = scmp.lt.s32.totalorder %s1722_s14, %s1715_s16 }
  0x30   : > { %p1718_p2 = pnand %p1716_p0, %p1704_p9 }
  0x31   : > { %p1725_p4 = por %p1724_p1, %p1723_p6 }
  0x32   : > { %p1719_p3 = pneg %p1718_p2 }
  0x34   : > { %p1726_p5 = pnand %p1725_p4, %p1719_p3 }
  0x36   : > { %1729 = shalt.err (!%p1726_p5)
}
  0x37   : > { %1593 = dma.hbm_to_vmem [thread:$0]  (!%p2061_p7), %s2393_s6, 16, %s487_s25, [#allocation10]  }
  0x38   : > { %s2394_s7 = sld [smem:[#allocation22_spill]] }
  0x3e   : > { %s1730_s24 = scalar_lea.hbm %s2394_s7, 16 }
  0x3f   : > { %p1731_p8 = scmp.ne.s32.totalorder %s2394_s7, %s1730_s24  ;;  %p1737_p5 = scmp.lt.u32.totalorder %s1730_s24, %s2394_s7 }
  0x41   : > { %p1733_p1 = pnand %p1731_p8, %p1704_p9 }
  0x43   : > { %p1734_p4 = pneg %p1733_p1 }
  0x45   : > { %p1739_p10 = pnand %p1737_p5, %p1734_p4 }
  0x47   : > { %1742 = shalt.err (!%p1739_p10)
}
  0x48   : > { %s1743_s25 = scalar_lea.vmem %s2065_s27, 16  ;;  %s1750_s11 = scalar_lea.vmem %s2065_s27, 32 }
  0x49   : > { %p1744_p11 = scmp.ne.s32.totalorder %s2065_s27, %s1743_s25  ;;  %p1751_p0 = scmp.lt.s32.totalorder %s2065_s27, %s2065_s27 }
  0x4a   : > { %p1752_p2 = scmp.lt.s32.totalorder %s1750_s11, %s1743_s25 }
  0x4b   : > { %p1746_p12 = pnand %p1744_p11, %p1704_p9 }
  0x4c   : > { %p1753_p3 = por %p1752_p2, %p1751_p0 }
  0x4d   : > { %p1747_p13 = pneg %p1746_p12 }
  0x4f   : > { %p1754_p6 = pnand %p1753_p3, %p1747_p13 }
  0x51   : > { %1757 = shalt.err (!%p1754_p6)
}
  0x52   : > { %1596 = dma.hbm_to_vmem [thread:$0]  (!%p2061_p7), %s2394_s7, 16, %s2065_s27, [#allocation10]  }
  0x53   : > { %s42_s15 = sadd.s32 1, %s1880_s19  ;;  %s45_s18 = sadd.s32 1, %s1884_s1 }
  0x54   : > { %p43_p9 = scmp.ge.s32.totalorder %s42_s15, 2  ;;  %s73_s21 = sadd.s32 1, %s1868_s29 }
  0x55   : > { %p80_p8 = scmp.ne.s32.totalorder %s1868_s29, %s1864_s28  ;;  %p81_p1 = scmp.eq.s32.totalorder %s1888_s20, 0 }
  0x56   : > { %s2426_s15 = smov (%p43_p9, %s42_s15), 0  ;;  %s2428_s18 = smov (!%p43_p9, %s45_s18), %s1884_s1 }
  0x57   : > { %2395 = sst [smem:[#allocation16_spill]] %s2426_s15  ;;  %s70_s24 = ssub.s32 %s1880_s19, %s2426_s15 }
  0x58   : > { %p2126_p4 = por %p81_p1, %p80_p8  ;;  %p47_p5 = scmp.ge.s32.totalorder %s2428_s18, 2 }
  0x59   : > { %p71_p7 = scmp.eq.s32.totalorder %s70_s24, 0  ;;  %p1603_p10 = scmp.lt.s32.totalorder %s1888_s20, 4 }
  0x5a   : > { %s538_s27 = sand.u32 1, %s1868_s29   ;;  %s2430_s18 = smov (%p47_p5, %s2428_s18), 0 }
  0x5b   : > { %2397 = sst [smem:[#allocation17_spill]] %s2430_s18  ;;  %s1453_s14 = sshll.u32 %s538_s27, 2 }
  0x5c   : > { %s2135_s16 = scalar_select %p71_p7, %s1868_s29, %s73_s21  }
  0x5d   : > { %s1454_s25 = sshll.u32 %s1880_s19, 6  ;;  %s2398_s13 = sld [smem:[#allocation19_spill]] }
  0x5e   : > { %s542_s7 = scalar_lea.vmem [#allocation6], %s1453_s14  ;;  %p2147_p11 = pnand %p1603_p10, %p2126_p4 }
  0x5f   : > { %s549_s15 = sshll.u32 %s542_s7, 4  ;;  %s539_s21 = scalar_lea.sflag [#allocation7], %s538_s27  ;;  %s2143_s15 = int_to_ptr.vmem [resolvable:$true] %s549_s15 }
  0x60   : > { %p1760_p13 = pneg %p2147_p11 }
  0x63   : > { %s2141_s6 = scalar_lea.hbm %s2398_s13, %s1454_s25  ;;  %s1763_s25 = scalar_lea.hbm %s2398_s13, 128 }
  0x64   : > { %s1758_s18 = scalar_lea.hbm %s2141_s6, 64  ;;  %p1764_p3 = scmp.lt.u32.totalorder %s2141_s6, %s2398_s13 }
  0x65   : > { %p1759_p12 = scmp.ne.s32.totalorder %s2141_s6, %s1758_s18  ;;  %p1765_p6 = scmp.lt.u32.totalorder %s1763_s25, %s1758_s18 }
  0x66   : > { %p1767_p8 = scmp.lt.u32.totalorder %s1758_s18, %s2141_s6 }
  0x67   : > { %p1761_p0 = pnand %p1760_p13, %p1759_p12  ;;  %p1766_p9 = por %p1765_p6, %p1764_p3 }
  0x69   : > { %p1762_p2 = pneg %p1761_p0  ;;  %p1768_p1 = por %p1767_p8, %p1766_p9 }
  0x6b   : > { %p1769_p4 = pnand %p1768_p1, %p1762_p2 }
  0x6d   : > { %1772 = shalt.err (!%p1769_p4)
}
  0x6e   : > { %s1773_s27 = scalar_lea.vmem %s2143_s15, 64  ;;  %s1892_s17 = smov [#allocation6]  }
  0x6f   : > { %p1774_p5 = scmp.ne.s32.totalorder %s2143_s15, %s1773_s27  ;;  %s1778_s14 = sshll.u32 %s1892_s17, 4  ;;  %s1779_s14 = int_to_ptr.vmem [resolvable:$false] %s1778_s14 }
  0x70   : > { %s1780_s7 = scalar_lea.vmem %s1779_s14, 128  ;;  %p1781_p12 = scmp.lt.s32.totalorder %s2143_s15, %s1779_s14 }
  0x71   : > { %p1776_p7 = pnand %p1774_p5, %p1760_p13  ;;  %p1782_p0 = scmp.lt.s32.totalorder %s1780_s7, %s1773_s27 }
  0x73   : > { %p1777_p10 = pneg %p1776_p7  ;;  %p1783_p3 = por %p1782_p0, %p1781_p12 }
  0x75   : > { %p1784_p6 = pnand %p1783_p3, %p1777_p10 }
  0x77   : > { %1787 = shalt.err (!%p1784_p6)
}
  0x78   : > { %1600 = dma.hbm_to_vmem [thread:$0]  (!%p2147_p11), %s2141_s6, 64, %s2143_s15, %s539_s21  }
  0x79   : > { %p2400_p2 = scmp.ne.s32.totalorder %s2391_s23, 0 }
  0x7a   : > { %s574_s18 = sand.u32 (!%p2400_p2), 1, %s1864_s28   ;;  %p2401_p13 = scmp.ne.s32.totalorder (!%p2400_p2), %s2390_s2, 0 }
  0x7b   : > { %572 = sbr.rel (%p2400_p2) target bundleno = 1880 (0x758), region = 92  ;;  %s2179_s25 = sshll.u32 (!%p2400_p2), %s574_s18, 2 }
  0x7c   : > { %s575_s26 = scalar_lea.sflag (!%p2400_p2), [#allocation7], %s574_s18  ;;  %s578_s11 = scalar_lea.vmem (!%p2400_p2), [#allocation6], %s2179_s25 }
  0x82   : > { %1847 = dma.done.wait (%p2401_p13), %s575_s26, 64  }
  0x83   : > { %1849 = vsyncadd (%p2401_p13), %s575_s26, 4294967232  ;;  %p2402_p9 = scmp.ne.s32.totalorder %s2389_s22, 0 }
  0x85   : > { %1851 = dma.done.wait (%p2402_p9), [#allocation10], 32  }
  0x86   : > { %1853 = vsyncadd (%p2402_p9), [#allocation10], 4294967264  ;;  %p642_p11 = scmp.lt.s32.totalorder %s1872_s30, 1  ;;  %p652_p8 = scmp.eq.s32.totalorder %s1876_s0, 0 }
  0x87   : > { %p653_p1 = scmp.eq.s32.totalorder %s1872_s30, 0  ;;  %s2403_s2 = sld [smem:[#allocation20_spill]] }
  0x88   : > { %s643_s6 = scalar_select %p642_p11, %s1872_s30, 1 }
  0x89   : > { %p654_p4 = pnand %p653_p1, %p652_p8 }
  0x8a   : > { %s1459_s23 = sshll.u32 %s643_s6, 3  ;;  %vm658_vm0 = vcmask (!%p654_p4), 253952   ;;  %vm661_vm1 = vcmask (!%p654_p4), 261120   ;;  %vm663_vm2 = vcmask (!%p654_p4), 7168   ;;  %v1893_v0 = vmov (!%p654_p4), 0.0  }
  0x8b   : > { %s2200_s14 = scalar_lea.vmem %s2352_s3, %s1459_s23  ;;  %657 = sbr.rel (%p654_p4) target bundleno = 146 (0x92), region = 108  ;;  %659 = vst.msk [vmem:[#allocation2] sm:$0x1] (!%p654_p4), %vm658_vm0, %v1893_v0  ;;  %660 = vst.msk [vmem:[#allocation3] sm:$0x1] (!%p654_p4), %vm658_vm0, %v1893_v0 }
  0x8c   : > { %662 = vst.msk [vmem:[#allocation4] sm:$0xff] (!%p654_p4), %vm661_vm1, %v1893_v0 }
  0x8d   : > { %s645_s21 = scalar_lea.vmem %s2403_s2, %s1459_s23  ;;  %664 = vst.msk [vmem:[#allocation5] sm:$0xff] (!%p654_p4), %vm663_vm2, %v1893_v0 }
  0x92 PF: > { %v665_v1 = vld [vmem:[%s645_s21] sm:$0xff]  ;;  %v1894_v2 = vmov 0   ;;  %v1895_v3 = vmov 0.0   ;;  %s2404_s18 = sld [smem:[#allocation18_spill]]  ;;  %vm679_vm3 = vcmask 1043456   ;;  %vm1896_vm4 = vmmov 0  }
  0x93   : > { %1685 = vset.pattern.permute.xlu0 %v1894_v2  ;;  %1514 = vmatprep.subr.bf16.mxu0 %v1895_v3  ;;  %v1686_v6 = vld [vmem:[%s2354_s5] sm:$0xff]   ;;  %v1687_v7 = vld [vmem:[%s2354_s5 + $0x8] sm:$0xff]   ;;  %v666_v8 = vlaneseq  ;;  %vm790_vm5 = vcmask 1041408   ;;  %vm675_vm7 = vcmask 64512   ;;  %v725_v15 = vld [vmem:[%s578_s11] sm:$0xf] }
  0x94   : > { %669 = vperm.xlu0 %1685, %v665_v1   ;;  %1520 = vmatprep.subr.bf16.mxu1 %v1895_v3  ;;  %v724_v11 = vld [vmem:[%s2353_s4] sm:$0x3]  ;;  %vm742_vm8 = vcmask 261120   ;;  %vm786_vm9 = vcmask 31744   ;;  %v1466_v26 = vld [vmem:[#allocation9] ss:$0 sm:$0xff] }
  0x95   : > { %1516 = vmatprep.mubr.msk.bf16.mxu0 %vm1896_vm4, %v1895_v3  ;;  %1524 = vmatprep.mubr.msk.bf16.mxu1 %vm1896_vm4, %v1895_v3  ;;  %v2215_v9 = vand.u32 127, %v666_v8  ;;  %v792_v14 = vsel %vm790_vm5, %v724_v11, 0  ;;  %p1467_p5 = scmp.ne.s32.totalorder %s1876_s0, 0 }
  0x96   : > { %1521 = vmatpush3.bf16.msra.mxu1 %v1686_v6  ;;  %v845_v44 = vld [vmem:[#allocation2] sm:$0x1] (!%p1467_p5)  ;;  %vm854_vm10 = vcmask (!%p1467_p5), 253952   ;;  %v856_v47 = vld [vmem:[#allocation3] sm:$0x1] (!%p1467_p5) }
  0x97   : > { %1522 = vmatprep.subr.bf16.mxu1 %v1895_v3 }
  0x98   : > { %v674_v4 = vld [vmem:[%s2404_s18] sm:$0xf] }
  0x99   : > { %v681_v5 = vsel %vm679_vm3, %v674_v4, 0 }
  0x9a   : > { %1515 = vmatpush3.bf16.msra.mxu0 %v681_v5  ;;  %1523 = vmatpush3.bf16.msra.mxu1 %v1687_v7 }
  0x9b   : > { %1528 = vmatprep.subr.bf16.mxu0 %v1895_v3 }
  0x9d   : > { %1525 = vmatmul.mubr.msk.bf16.vlgmr.msra.gmra.mrb[0].mxu1 %vm742_vm8, %v725_v15 }
 0x113   : > { %v670_v10 = vpop.permute.xlu0 %669 }
 0x114   : > { %vm671_vm6 = vcmp.eq.s32.totalorder %v2215_v9, %v670_v10 }
 0x115   : > { %v672_v12 = vsel %vm671_vm6, 1.0, %v1895_v3 }
 0x116   : > { %v673_v13 = vpack.c.bf16 %v672_v12, %v672_v12 }
 0x118   : > { %1517 = vmatmul.mubr.msk.bf16.vlgmr.msra.gmra.mrb[0].mxu0 %vm675_vm7, %v673_v13 }
 0x119   : > { %1529 = vmatpush3.bf16.msra.mxu0 %v792_v14  ;;  %1530 = vmatprep.mubr.msk.bf16.mxu0 %vm1896_vm4, %v1895_v3 }
 0x170   : > { %v780_v21 = vpop.f32.mrb[0].mxu1 }
 0x171   : > { %v1526_v22 = vpop.f32.mrb[1].mxu1 }
 0x172   : > { %v783_v23 = vpop.f32.mrb[2].mxu1 }
 0x173   : > { %v1527_v24 = vpop.f32.mrb[3].mxu1 }
 0x1eb   : > { %v717_v16 = vpop.f32.mrb[0].mxu0 }
 0x1ec   : > { %v723_v17 = vpack.c.bf16 %v717_v16, %v717_v16  ;;  %v1518_v18 = vpop.f32.mrb[1].mxu0 }
 0x1ed   : > { %v720_v19 = vpop.f32.mrb[2].mxu0 }
 0x1ee   : > { %v1519_v20 = vpop.f32.mrb[3].mxu0  ;;  %1531 = vmatmul.mubr.msk.bf16.vlgmr.msra.gmra.mrb[4].mxu0 %vm786_vm9, %v723_v17 }
 0x2be   : > { %844 = sbr.rel (%p1467_p5) target bundleno = 728 (0x2d8), region = 112 }
 0x2c1   : > { %v828_v25 = vpop.f32.mrb[4].mxu0 }
 0x2c2   : > { %v829_v27 = vadd.f32 %v828_v25, %v780_v21  ;;  %v1532_v28 = vpop.f32.mrb[5].mxu0 }
 0x2c3   : > { %v831_v29 = vpop.f32.mrb[6].mxu0 }
 0x2c4   : > { %v841_v30 = vadd.f32 %v1466_v26, %v829_v27  ;;  %v1533_v31 = vpop.f32.mrb[7].mxu0 }
 0x2c6   : > { %v846_v32 = vsel %vm742_vm8, %v841_v30, 0.0  ;;  %v857_v33 = vmul.f32 %v841_v30, %v841_v30 }
 0x2c7   : > { %v847_v34 = vrot.slane %v846_v32, 4 }
 0x2c8   : > { %v858_v35 = vsel %vm742_vm8, %v857_v33, 0.0 }
 0x2c9   : > { %v848_v36 = vadd.f32 %v847_v34, %v846_v32  ;;  %v859_v37 = vrot.slane %v858_v35, 4 }
 0x2cb   : > { %v849_v38 = vrot.slane %v848_v36, 2  ;;  %v860_v39 = vadd.f32 %v859_v37, %v858_v35 }
 0x2cd   : > { %v850_v40 = vadd.f32 %v849_v38, %v848_v36  ;;  %v861_v41 = vrot.slane %v860_v39, 2 }
 0x2cf   : > { %v851_v42 = vrot.slane %v850_v40, 1  ;;  %v862_v43 = vadd.f32 %v861_v41, %v860_v39 }
 0x2d1   : > { %v852_v45 = vadd.f32 %v851_v42, %v850_v40  ;;  %v863_v46 = vrot.slane %v862_v43, 1 }
 0x2d3   : > { %v853_v48 = vadd.f32 %v852_v45, %v845_v44  ;;  %v864_v49 = vadd.f32 %v863_v46, %v862_v43 }
 0x2d5   : > { %855 = vst.msk [vmem:[#allocation2] sm:$0x1] %vm854_vm10, %v853_v48  ;;  %v865_v50 = vadd.f32 %v864_v49, %v856_v47 }
 0x2d7   : > { %866 = vst.msk [vmem:[#allocation3] sm:$0x1] %vm854_vm10, %v865_v50 }
 0x2d8 PF: > { %p867_p7 = scmp.eq.s32.totalorder %s1876_s0, 1  ;;  %p1468_p10 = scmp.ne.s32.totalorder %s1876_s0, 1 }
 0x2d9   : > { %v978_v51 = vld [vmem:[%s2200_s14] sm:$0xff] (!%p1468_p10)  ;;  %v1897_v53 = vmov (!%p1468_p10), 0   ;;  %v1898_v54 = vmov (!%p1468_p10), 0.0   ;;  %v1690_v55 = vld [vmem:[%s2358_s9 + $0x8] sm:$0xff] (!%p1468_p10)   ;;  %vm1899_vm11 = vmmov (!%p1468_p10), 0   ;;  %v880_v63 = vshrl.u32 (!%p1468_p10), %v666_v8, 7 }
 0x2da   : > { %870 = sbr.rel (%p1468_p10) target bundleno = 1209 (0x4b9), region = 116  ;;  %v1689_v52 = vld [vmem:[%s2358_s9] sm:$0xff] (!%p1468_p10)   ;;  %1688 = vset.pattern.permute.xlu0 (!%p1468_p10), %v1897_v53  ;;  %1534 = vmatprep.subr.bf16.mxu0 (!%p1468_p10), %v1898_v54  ;;  %v1469_v6 = vld [vmem:[#allocation11] ss:$0 sm:$0xff] (!%p1468_p10)  ;;  %v1053_v26 = vsel (!%p1468_p10), %vm679_vm3, 1065369472, %v1897_v53 }
 0x2db   : > { %980 = vperm.xlu0 (!%p1468_p10), %1688, %v978_v51   ;;  %1535 = vmatpush3.bf16.msra.mxu0 (!%p1468_p10), %v1689_v52  ;;  %v881_v1 = vsub.s32 (!%p1468_p10), 0, %v880_v63  ;;  %v1470_v10 = vld [vmem:[%s2357_s8] ss:$0 sm:$0xff] (!%p1468_p10)  ;;  %v1051_v32 = vld [vmem:[#allocation5] sm:$0xff] (!%p1468_p10)  ;;  %vm1096_vm13 = vcmask (!%p1468_p10), 7168  }
 0x2dc   : > { %v871_v56 = vld [vmem:[#allocation2] sm:$0x1] (!%p1468_p10)  ;;  %1536 = vmatprep.subr.bf16.mxu0 (!%p1468_p10), %v1898_v54  ;;  %1538 = vmatprep.mubr.msk.bf16.mxu0 (!%p1468_p10), %vm1899_vm11, %v1898_v54 }
 0x2dd   : > { %v872_v57 = vmul.f32 (!%p1468_p10), 0.0625, %v871_v56  ;;  %1542 = vmatprep.subr.bf16.mxu1 (!%p1468_p10), %v1898_v54  ;;  %1544 = vmatprep.mubr.msk.bf16.mxu1 (!%p1468_p10), %vm1899_vm11, %v1898_v54  ;;  %v1471_v17 = vld [vmem:[%s2359_s10] ss:$0 sm:$0xff] (!%p1468_p10) }
 0x2de   : > { %v873_v58 = vld [vmem:[#allocation3] sm:$0x1] (!%p1468_p10) }
 0x2df   : > { %v874_v59 = vmul.f32 (!%p1468_p10), 0.0625, %v873_v58  ;;  %v875_v60 = vmul.f32 (!%p1468_p10), %v872_v57, %v872_v57  ;;  %1537 = vmatpush3.bf16.msra.mxu0 (!%p1468_p10), %v1690_v55  ;;  %v882_v2 = vrot.slane (!%p1468_p10), %v872_v57, %v881_v1 }
 0x2e1   : > { %v876_v61 = vsub.f32 %v874_v59, %v875_v60  ;;  %v884_v3 = vsub.f32 %v841_v30, %v882_v2 }
 0x2e3   : > { %v877_v62 = vmax.f32 %v876_v61, 0.0 }
 0x2e5   : > { %v885_v0 = vadd.f32 1e-05, %v877_v62 }
 0x2e7   : > { %1691 = vrsqrt.f32 %v885_v0 }
 0x2f1   : > { %v1692_v4 = vpop.eup %1691 }
 0x2f2   : > { %v891_v5 = vrot.slane %v1692_v4, %v881_v1 }
 0x2f4   : > { %v893_v7 = vmul.f32 %v891_v5, %v884_v3 }
 0x2f6   : > { %v901_v11 = vmul.f32 %v1469_v6, %v893_v7 }
 0x2f8   : > { %v909_v12 = vadd.f32 %v1470_v10, %v901_v11 }
 0x2fa   : > { %v910_v13 = vmax.f32 %v909_v12, 0.0 }
 0x2fc   : > { %v911_v14 = vpack.c.bf16 %v910_v13, %v910_v13 }
 0x2fe   : > { %1539 = vmatmul.mubr.msk.bf16.vlgmr.msra.gmra.mrb[0].mxu0 %vm742_vm8, %v911_v14 }
 0x35a   : > { %v981_v8 = vpop.permute.xlu0 %980 }
 0x35b   : > { %vm982_vm12 = vcmp.eq.s32.totalorder %v2215_v9, %v981_v8  ;;  %v985_v9 = vld [vmem:[#allocation4] sm:$0xff] }
 0x35c   : > { %v983_v15 = vsel %vm982_vm12, 1.0, %v1898_v54 }
 0x35d   : > { %v984_v16 = vpack.c.bf16 %v983_v15, %v983_v15 }
 0x35f   : > { %987 = vxpose.xlu0.c.b16.start.end [1/1] (short) (narrow) %v984_v16, 16 }
 0x3c5   : > { %v995_v25 = vpop.trf.xlu0 }
 0x3d1   : > { %v972_v18 = vpop.f32.mrb[0].mxu0 }
 0x3d2   : > { %v973_v19 = vadd.f32 %v1471_v17, %v972_v18  ;;  %v1540_v20 = vpop.f32.mrb[1].mxu0 }
 0x3d3   : > { %v975_v21 = vpop.f32.mrb[2].mxu0 }
 0x3d4   : > { %v1541_v22 = vpop.f32.mrb[3].mxu0  ;;  %v986_v23 = vpack.c.bf16 %v973_v19, %v973_v19 }
 0x3d6   : > { %v1007_v24 = vsel %vm679_vm3, %v986_v23, 0 }
 0x3d7   : > { %1543 = vmatpush3.bf16.msra.mxu1 %v1007_v24 }
 0x3d8   : > { %1548 = vmatprep.subr.bf16.mxu1 %v1898_v54 }
 0x3da   : > { %1545 = vmatmul.mubr.msk.bf16.vlgmr.msra.gmra.mrb[0].mxu1 %vm675_vm7, %v995_v25 }
 0x3db   : > { %1549 = vmatpush3.bf16.msra.mxu1 %v1053_v26  ;;  %1550 = vmatprep.mubr.msk.bf16.mxu1 %vm1899_vm11, %v1898_v54 }
 0x3e2   : > { %1551 = vmatmul.mubr.msk.bf16.vlgmr.msra.gmra.mrb[4].mxu1 %vm675_vm7, %v995_v25 }
 0x4ad   : > { %v1043_v27 = vpop.f32.mrb[0].mxu1 }
 0x4ae   : > { %v1049_v28 = vadd.f32 %v1043_v27, %v985_v9  ;;  %v1546_v29 = vpop.f32.mrb[1].mxu1 }
 0x4af   : > { %v1046_v30 = vpop.f32.mrb[2].mxu1 }
 0x4b0   : > { %1050 = vst.msk [vmem:[#allocation4] sm:$0xff] %vm742_vm8, %v1049_v28  ;;  %v1547_v31 = vpop.f32.mrb[3].mxu1 }
 0x4b5   : > { %v1089_v33 = vpop.f32.mrb[4].mxu1 }
 0x4b6   : > { %v1095_v34 = vadd.f32 %v1089_v33, %v1051_v32  ;;  %v1552_v35 = vpop.f32.mrb[5].mxu1 }
 0x4b7   : > { %v1092_v36 = vpop.f32.mrb[6].mxu1 }
 0x4b8   : > { %1097 = vst.msk [vmem:[#allocation5] sm:$0xff] %vm1096_vm13, %v1095_v34  ;;  %v1553_v37 = vpop.f32.mrb[7].mxu1 }
 0x4b9 PF: > { %p1098_p12 = scmp.eq.s32.totalorder %s1872_s30, 1 }
 0x4bb   : > { %p1099_p0 = pnand %p1098_p12, %p867_p7 }
 0x4bc   : > { %v1694_v39 = vld [vmem:[%s2361_s12] sm:$0xff] (!%p1099_p0)   ;;  %v1900_v40 = vmov (!%p1099_p0), 0   ;;  %v1901_v42 = vmov (!%p1099_p0), 0.0   ;;  %s2405_s15 = sld [smem:[#allocation23_spill]] (!%p1099_p0)  ;;  %v1695_v46 = vld [vmem:[%s2361_s12 + $0x8] sm:$0xff] (!%p1099_p0)   ;;  %vm1902_vm14 = vmmov (!%p1099_p0), 0  }
 0x4bd   : > { %1102 = sbr.rel (%p1099_p0) target bundleno = 1849 (0x739), region = 120  ;;  %1693 = vset.pattern.permute.xlu0 (!%p1099_p0), %v1900_v40  ;;  %1554 = vmatprep.subr.bf16.mxu0 (!%p1099_p0), %v1901_v42  ;;  %s2406_s25 = sld [smem:[#allocation18_spill]] (!%p1099_p0)  ;;  %v1106_v48 = vld [vmem:[#allocation4] sm:$0xff] (!%p1099_p0) }
 0x4be   : > { %1555 = vmatpush3.bf16.msra.mxu0 (!%p1099_p0), %v1694_v39  ;;  %1562 = vmatprep.subr.bf16.mxu1 (!%p1099_p0), %v1901_v42  ;;  %s2407_s27 = sld [smem:[#allocation27_spill]] (!%p1099_p0)  ;;  %s2409_s26 = sld [smem:[#allocation24_spill]] (!%p1099_p0) }
 0x4bf   : > { %v1103_v38 = vld [vmem:[#allocation5] sm:$0xff] (!%p1099_p0)  ;;  %1556 = vmatprep.subr.bf16.mxu0 (!%p1099_p0), %v1901_v42  ;;  %1564 = vmatprep.mubr.msk.bf16.mxu1 (!%p1099_p0), %vm1902_vm14, %v1901_v42  ;;  %s2411_s24 = sld [smem:[#allocation26_spill]] (!%p1099_p0)  ;;  %s2412_s11 = sld [smem:[#allocation28_spill]] (!%p1099_p0) }
 0x4c0   : > { %v1104_v41 = vmax.f32 (!%p1099_p0), %v1103_v38, 1.0  ;;  %1558 = vmatprep.mubr.msk.bf16.mxu0 (!%p1099_p0), %vm1902_vm14, %v1901_v42 }
 0x4c2   : > { %v1114_v43 = vld [vmem:[%s2405_s15] sm:$0x3] (!%p1099_p0)  ;;  %1698 = vrcp.f32 (!%p1099_p0), %v1104_v41  ;;  %1557 = vmatpush3.bf16.msra.mxu0 (!%p1099_p0), %v1695_v46  ;;  %s2410_s15 = sld [smem:[#allocation25_spill]] (!%p1099_p0) }
 0x4c3   : > { %v1179_v44 = vsel (!%p1099_p0), %vm790_vm5, %v1114_v43, 0  ;;  %v1113_v47 = vld [vmem:[%s2406_s25] sm:$0xf] (!%p1099_p0) }
 0x4c4   : > { %1563 = vmatpush3.bf16.msra.mxu1 %v1179_v44  ;;  %s2408_s17 = smov %s2407_s27  ;;  %v1696_v56 = vld [vmem:[%s2407_s27] sm:$0xff]  }
 0x4c5   : > { %1568 = vmatprep.subr.bf16.mxu1 %v1901_v42  ;;  %v1697_v57 = vld [vmem:[%s2408_s17 + $0x8] sm:$0xff]   ;;  %v1481_v59 = vld [vmem:[%s2409_s26] ss:$0 sm:$0xff] }
 0x4c6   : > { %v1483_v24 = vld [vmem:[%s2411_s24] ss:$0 sm:$0xff] }
 0x4c7   : > { %1565 = vmatmul.mubr.msk.bf16.vlgmr.msra.gmra.mrb[0].mxu1 %vm786_vm9, %v1113_v47  ;;  %v1484_v28 = vld [vmem:[%s2412_s11] ss:$0 sm:$0xff] }
 0x4c8   : > { %1572 = vmatprep.mubr.msk.bf16.mxu1 %vm1902_vm14, %v1901_v42  ;;  %1569 = vmatpush3.bf16.msra.mxu1 %v1696_v56  ;;  %v1482_v22 = vld [vmem:[%s2410_s15] ss:$0 sm:$0xff] }
 0x4c9   : > { %1570 = vmatprep.subr.bf16.mxu1 %v1901_v42 }
 0x4cc   : > { %v1699_v45 = vpop.eup %1698  ;;  %1571 = vmatpush3.bf16.msra.mxu1 %v1697_v57 }
 0x4cd   : > { %1109 = vperm.xlu0 %1693, %v1699_v45  }
 0x54c   : > { %v1110_v49 = vpop.permute.xlu0 %1109 }
 0x54d   : > { %v1112_v50 = vmul.f32 %v1110_v49, %v1106_v48 }
 0x54f   : > { %v1115_v51 = vpack.c.bf16 %v1112_v50, %v1112_v50 }
 0x551   : > { %1559 = vmatmul.mubr.msk.bf16.vlgmr.msra.gmra.mrb[0].mxu0 %vm742_vm8, %v1115_v51 }
 0x59a   : > { %v1215_v52 = vpop.f32.mrb[0].mxu1 }
 0x59b   : > { %v1566_v53 = vpop.f32.mrb[1].mxu1 }
 0x59c   : > { %v1218_v54 = vpop.f32.mrb[2].mxu1 }
 0x59d   : > { %v1567_v55 = vpop.f32.mrb[3].mxu1 }
 0x624   : > { %v1169_v58 = vpop.f32.mrb[0].mxu0 }
 0x625   : > { %v1216_v60 = vadd.f32 %v1215_v52, %v1169_v58  ;;  %v1560_v61 = vpop.f32.mrb[1].mxu0 }
 0x626   : > { %v1172_v62 = vpop.f32.mrb[2].mxu0 }
 0x627   : > { %v1228_v63 = vadd.f32 %v1481_v59, %v1216_v60  ;;  %v1561_v0 = vpop.f32.mrb[3].mxu0 }
 0x629   : > { %v1229_v1 = vsel %vm742_vm8, %v1228_v63, 0.0 }
 0x62a   : > { %v1230_v2 = vrot.slane %v1229_v1, 4 }
 0x62c   : > { %v1231_v3 = vadd.f32 %v1230_v2, %v1229_v1 }
 0x62e   : > { %v1232_v4 = vrot.slane %v1231_v3, 2 }
 0x630   : > { %v1233_v5 = vadd.f32 %v1232_v4, %v1231_v3 }
 0x632   : > { %v1234_v6 = vrot.slane %v1233_v5, 1 }
 0x634   : > { %v1235_v7 = vadd.f32 %v1234_v6, %v1233_v5 }
 0x636   : > { %v1237_v10 = vmul.f32 0.125, %v1235_v7 }
 0x638   : > { %v1238_v11 = vsub.f32 %v1228_v63, %v1237_v10 }
 0x63a   : > { %v1239_v12 = vmul.f32 %v1238_v11, %v1238_v11 }
 0x63c   : > { %v1240_v13 = vsel %vm742_vm8, %v1239_v12, 0.0 }
 0x63d   : > { %v1241_v14 = vrot.slane %v1240_v13, 4 }
 0x63f   : > { %v1242_v8 = vadd.f32 %v1241_v14, %v1240_v13 }
 0x641   : > { %v1243_v15 = vrot.slane %v1242_v8, 2 }
 0x643   : > { %v1244_v16 = vadd.f32 %v1243_v15, %v1242_v8 }
 0x645   : > { %v1245_v17 = vrot.slane %v1244_v16, 1 }
 0x647   : > { %v1246_v18 = vadd.f32 %v1245_v17, %v1244_v16 }
 0x649   : > { %v1247_v19 = vmul.f32 0.125, %v1246_v18 }
 0x64b   : > { %v1248_v20 = vadd.f32 1e-05, %v1247_v19 }
 0x64d   : > { %1700 = vrsqrt.f32 %v1248_v20 }
 0x657   : > { %v1701_v21 = vpop.eup %1700 }
 0x658   : > { %v1250_v23 = vmul.f32 %v1701_v21, %v1238_v11 }
 0x65a   : > { %v1258_v25 = vmul.f32 %v1482_v22, %v1250_v23 }
 0x65c   : > { %v1266_v26 = vadd.f32 %v1483_v24, %v1258_v25 }
 0x65e   : > { %v1267_v9 = vmax.f32 %v1266_v26, 0.0 }
 0x660   : > { %v1268_v27 = vpack.c.bf16 %v1267_v9, %v1267_v9 }
 0x662   : > { %1573 = vmatmul.mubr.msk.bf16.vlgmr.msra.gmra.mrb[4].mxu1 %vm742_vm8, %v1268_v27 }
 0x735   : > { %v1329_v29 = vpop.f32.mrb[4].mxu1 }
 0x736   : > { %v1330_v30 = vadd.f32 %v1484_v28, %v1329_v29  ;;  %v1574_v31 = vpop.f32.mrb[5].mxu1 }
 0x737   : > { %v1332_v32 = vpop.f32.mrb[6].mxu1 }
 0x738   : > { %1335 = vst.msk [vmem:[#allocation12] sm:$0xff] %vm742_vm8, %v1330_v30  ;;  %v1575_v33 = vpop.f32.mrb[7].mxu1 }
 0x739 PF: > { %s2413_s21 = sadd.s32 4294967295, %s1888_s20   ;;  %s1903_s14 = smov [#allocation12]  }
 0x73a   : > { %p2299_p3 = scmp.eq.s32.totalorder %s2413_s21, 3  ;;  %s1343_s22 = sshll.u32 %s1903_s14, 4  ;;  %s1344_s22 = int_to_ptr.vmem [resolvable:$true] %s1343_s22 }
 0x73b   : > { %s1788_s7 = scalar_lea.vmem %s1344_s22, 128  ;;  %p1795_p9 = scmp.lt.s32.totalorder %s1344_s22, %s1344_s22 }
 0x73c   : > { %p1789_p6 = scmp.ne.s32.totalorder %s1344_s22, %s1788_s7  ;;  %p1796_p11 = scmp.lt.s32.totalorder %s1788_s7, %s1788_s7 }
 0x73e   : > { %p1790_p2 = pnand %p1789_p6, %p2299_p3  ;;  %p1797_p8 = por %p1796_p11, %p1795_p9 }
 0x740   : > { %p1791_p13 = pneg %p1790_p2 }
 0x742   : > { %p1798_p1 = pnand %p1797_p8, %p1791_p13 }
 0x744   : > { %1801 = shalt.err (!%p1798_p1)
}
 0x745   : > { %s2415_s6 = sld [smem:[#allocation29_spill]] }
 0x74b   : > { %s1802_s23 = scalar_lea.hbm %s2415_s6, 128 }
 0x74c   : > { %p1803_p4 = scmp.ne.s32.totalorder %s2415_s6, %s1802_s23  ;;  %p1808_p10 = scmp.lt.u32.totalorder %s1802_s23, %s2415_s6 }
 0x74e   : > { %p1804_p5 = pnand %p1803_p4, %p2299_p3 }
 0x750   : > { %p1805_p7 = pneg %p1804_p5 }
 0x752   : > { %p1810_p12 = pnand %p1808_p10, %p1805_p7 }
 0x754   : > { %1813 = shalt.err (!%p1810_p12)
}
 0x755   : > { %1587 = dma.vmem_to_hbm [thread:$0]  (%p2299_p3), %s1344_s22, 128, %s2415_s6, [#allocation8]  }
 0x756   : > { %1855 = dma.done.wait (%p2299_p3), [#allocation8], 128  }
 0x757   : > { %1857 = vsyncadd (%p2299_p3), [#allocation8], 4294967168 }
 0x758 PF: > { %s33_s20 = sadd.s32 1, %s1888_s20   ;;  %s2416_s11 = sld [smem:[#allocation16_spill]] }
 0x759   : > { %p30_p0 = scmp.ge.s32.totalorder %s33_s20, 6   ;;  %s2417_s21 = sld [smem:[#allocation17_spill]] }
 0x75a   : > { %s2418_s27 = smov %s1864_s28  ;;  %s2419_s28 = smov %s1868_s29 }
 0x75b   : > { %s2420_s29 = smov %s2135_s16  ;;  %s2421_s30 = smov %s1880_s19 }
 0x75c   : > { %s2422_s0 = smov %s1884_s1  ;;  %32 = sbr.rel (!%p30_p0) target bundleno = 20 (0x14), region = 159 }
 0x75e   : > { %s2423_s19 = smov %s2416_s11 }
 0x75f   : > { %s2424_s1 = smov %s2417_s21 }
 0x763   :  { %1356 = vsyncpa [#allocation7], 1 }
 0x764   :  { %1358 = vsyncpa [#allocation7 + $0x1], 1 }
 0x765   :  { %1359 = vsyncpa [#allocation10], 1 }
 0x766   :  { %1360 = vsyncpa [#allocation8], 1 }
 0x767   :  { %1362 = vsyncpa [#allocation8 + $0x1], 1 }

</bundles_post_ra>
